<compile_context>
chip_gen: v5e
topology: v5e:2x2
jax: 0.10.0
libtpu: 0.0.40
codegen_flags: <defaults>
</compile_context>

<pallas_src>
import jax
import jax.numpy as jnp
from jax.experimental import pallas as pl
from jax.experimental.pallas import tpu as pltpu

D_IN = 768
D_HID = 512
LANE = 128


def _round_up(n, m):
    return ((n + m - 1) // m) * m


def _fused_mlp_kernel(x_ref, w_ref, b_ref, o_ref):
    # x_ref: (TB, 768) f32/bf16   w_ref: (768, Cp) bf16   b_ref: (1, Cp) f32
    # o_ref: (TB, Cp)  f32/bf16
    # Cast to bf16 in-kernel (avoids a separate wrapper-side pad/cast pass of x).
    x_bf = x_ref[...].astype(jnp.bfloat16)
    out = jnp.dot(x_bf, w_ref[...], preferred_element_type=jnp.float32)
    o_ref[...] = (out + b_ref[...]).astype(o_ref.dtype)


def prepare_params(w1_t, b1, w2_t, b2):
    """One-time parameter prep (do this once and cache; not on the per-call path).

    w1_t: [768, 512], b1: [512], w2_t: [512, C], b2: [C]  (pre-transposed [in, out]).
    Returns (w_fused [768, C_pad] bf16, b_fused [1, C_pad] f32, C).
    """
    C = w2_t.shape[1]
    C_pad = _round_up(max(C, LANE), LANE)
    # Dropout(0.2) is identity in eval mode and there is no nonlinearity, so
    #   y = (x @ W1 + b1) @ W2 + b2 = x @ (W1 @ W2) + (b1 @ W2 + b2).
    # Fuse in f32, cast the fused weight to bf16 once.
    # TODO(synk): training-mode dropout (mask/scale on the hidden layer) is not
    # applied; it would also invalidate this W1@W2 fusion.
    w_fused = jnp.dot(w1_t.astype(jnp.float32), w2_t.astype(jnp.float32))      # [768, C]
    b_fused = jnp.dot(b1.astype(jnp.float32), w2_t.astype(jnp.float32)) + b2   # [C]
    w_fused = jnp.pad(w_fused, ((0, 0), (0, C_pad - C))).astype(jnp.bfloat16)
    b_fused = jnp.pad(b_fused, ((0, C_pad - C),)).reshape(1, C_pad).astype(jnp.float32)
    return w_fused, b_fused, C


def _pick_tile_b(B):
    # Small batches: one tile, rounded to the bf16 sublane pack (16 rows).
    if B <= 256:
        return max(16, _round_up(B, 16))
    # Large batches: big tiles (amortize ~0.35us/grid-step) capped at 2048 rows,
    # rounded to 128 (dense MXU row dim), keeping >= ~4 grid steps so v7x's two
    # TensorCores each get >= 2 pipelined steps.
    return min(2048, _round_up(pl.cdiv(B, 4), 128))


def probing_target_predictor(x, params, *, tile_b=None, out_dtype=jnp.float32):
    """x: [B, 768] (f32 or bf16); params from prepare_params(); returns [B, C]."""
    w_fused, b_fused, C = params
    B = x.shape[0]
    C_pad = w_fused.shape[1]

    if tile_b is None:
        tile_b = _pick_tile_b(B)
    assert tile_b % 8 == 0, "tile_b must be a multiple of 8 (prefer 16/128)"

    n_tiles = pl.cdiv(B, tile_b)  # ragged last tile: OOB rows masked on store

    flops = 2 * B * D_IN * C_pad
    bytes_accessed = (B * D_IN * x.dtype.itemsize
                      + w_fused.size * 2
                      + b_fused.size * 4
                      + B * C_pad * jnp.dtype(out_dtype).itemsize)

    out_padded = pl.pallas_call(
        _fused_mlp_kernel,
        out_shape=jax.ShapeDtypeStruct((B, C_pad), out_dtype),
        grid_spec=pltpu.PrefetchScalarGridSpec(
            num_scalar_prefetch=0,
            grid=(n_tiles,),
            in_specs=[
                pl.BlockSpec((tile_b, D_IN), lambda i: (i, 0)),   # x tile (streamed)
                pl.BlockSpec((D_IN, C_pad), lambda i: (0, 0)),    # fused W (resident)
                pl.BlockSpec((1, C_pad), lambda i: (0, 0)),       # fused b (resident)
            ],
            out_specs=pl.BlockSpec((tile_b, C_pad), lambda i: (i, 0)),
        ),
        compiler_params=pltpu.CompilerParams(
            dimension_semantics=("parallel",),
            vmem_limit_bytes=32 * 1024 * 1024,
        ),
        cost_estimate=pl.CostEstimate(
            flops=flops, transcendentals=0, bytes_accessed=bytes_accessed),
    )(x, w_fused, b_fused)

    return out_padded[:, :C]


if __name__ == "__main__":
    num_of_classes = 16
    batch = 20  # not a multiple of the tile -> exercises the masked ragged last tile

    key = jax.random.PRNGKey(0)
    k_x, k_w1, k_b1, k_w2, k_b2 = jax.random.split(key, 5)

    # Deterministic synthetic parameters (PyTorch shapes: W1 [512,768], W2 [C,512]);
    # kept pre-transposed as [in, out] for the kernel.
    x = jax.random.normal(k_x, (batch, D_IN), dtype=jnp.float32)
    w1_t = (jax.random.normal(k_w1, (D_IN, D_HID), dtype=jnp.float32)
            * (1.0 / jnp.sqrt(D_IN)))
    b1 = jax.random.normal(k_b1, (D_HID,), dtype=jnp.float32) * 0.01
    w2_t = (jax.random.normal(k_w2, (D_HID, num_of_classes), dtype=jnp.float32)
            * (1.0 / jnp.sqrt(D_HID)))
    b2 = jax.random.normal(k_b2, (num_of_classes,), dtype=jnp.float32) * 0.01

    # One-time fused parameter prep (would be cached in a real pipeline).
    params = prepare_params(w1_t, b1, w2_t, b2)

    # Small tile_b so the demo exercises a multi-tile grid (cdiv(20, 16) = 2 steps:
    # one full tile + one ragged, masked tile) while keeping shapes tiny.
    out = probing_target_predictor(x, params, tile_b=16)
    out = jax.block_until_ready(out)
    assert out.shape == (batch, num_of_classes)

    # Tight check vs. a reference mirroring the kernel's numerics exactly
    # (bf16 x and fused weight, f32 accumulate, f32 bias).
    w_fused_bf, b_fused_f32, _ = params
    ref_bf = (jnp.dot(x.astype(jnp.bfloat16), w_fused_bf,
                      preferred_element_type=jnp.float32)
              + b_fused_f32)[:, :num_of_classes]
    assert jnp.allclose(out, ref_bf, atol=2e-2, rtol=2e-2), "mismatch vs bf16 reference"

    # Loose sanity check against the pure-f32 module semantics
    # (Linear -> Dropout(eval, identity) -> Linear).
    ref_f32 = (x @ w1_t + b1) @ w2_t + b2
    assert jnp.allclose(out, ref_f32, atol=0.1, rtol=0.05), "mismatch vs f32 reference"

    print("KERNEL_OK")
</pallas_src>

<mosaic_0001>
module attributes {stable_mosaic.version = 11 : i64} {
  func.func @_fused_mlp_kernel(%arg0: i32, %arg1: memref<16x768xf32, #tpu.memory_space<vmem>>, %arg2: memref<768x128xbf16, #tpu.memory_space<vmem>>, %arg3: memref<1x128xf32, #tpu.memory_space<vmem>>, %arg4: memref<16x128xf32, #tpu.memory_space<vmem>>) attributes {dimension_semantics = [#tpu.dimension_semantics<parallel>], iteration_bounds = array<i64: 2>, scalar_prefetch = 0 : i64, scratch_operands = 0 : i64, tpu.core_type = #tpu.core_type<tc>, window_params = [{transform_indices = @transform_0, window_bounds = array<i64: 16, 768>}, {pipeline_mode = #tpu.pipeline_mode<synchronous>, transform_indices = @transform_1, window_bounds = array<i64: 768, 128>}, {pipeline_mode = #tpu.pipeline_mode<synchronous>, transform_indices = @transform_2, window_bounds = array<i64: 1, 128>}, {transform_indices = @transform_3, window_bounds = array<i64: 16, 128>}]} {
    %c0 = arith.constant 0 : index
    %c0_0 = arith.constant 0 : index
    %0 = vector.load %arg1[%c0, %c0_0] : memref<16x768xf32, #tpu.memory_space<vmem>>, vector<16x768xf32>
    %1 = arith.truncf %0 : vector<16x768xf32> to vector<16x768xbf16>
    %c0_1 = arith.constant 0 : index
    %c0_2 = arith.constant 0 : index
    %2 = vector.load %arg2[%c0_1, %c0_2] : memref<768x128xbf16, #tpu.memory_space<vmem>>, vector<768x128xbf16>
    %cst = arith.constant dense<0.000000e+00> : vector<16x128xf32>
    %3 = tpu.matmul %1, %2, %cst {dimension_numbers = #tpu.dot_dimension_numbers<[1], [0], [0], [1], [0, 0, 1, 1], [], []>} : vector<16x768xbf16>, vector<768x128xbf16>, vector<16x128xf32> -> vector<16x128xf32>
    %c0_3 = arith.constant 0 : index
    %c0_4 = arith.constant 0 : index
    %4 = vector.load %arg3[%c0_3, %c0_4] : memref<1x128xf32, #tpu.memory_space<vmem>>, vector<1x128xf32>
    %5 = vector.broadcast %4 : vector<1x128xf32> to vector<16x128xf32>
    %6 = arith.addf %3, %5 : vector<16x128xf32>
    %c0_5 = arith.constant 0 : index
    %c0_6 = arith.constant 0 : index
    %7 = vector.load %arg4[%c0_5, %c0_6] : memref<16x128xf32, #tpu.memory_space<vmem>>, vector<16x128xf32>
    tpu.vector_store %arg4[%c0_5, %c0_6], %6 {strides = array<i32>} : memref<16x128xf32, #tpu.memory_space<vmem>>, vector<16x128xf32>,
    return
  }
  func.func @transform_0(%arg0: i32) -> (i32, i32) {
    %c0_i32 = arith.constant 0 : i32
    %c0_i32_0 = arith.constant 0 : i32
    return %arg0, %c0_i32 : i32, i32
  }
  func.func @transform_1(%arg0: i32) -> (i32, i32) {
    %c0_i32 = arith.constant 0 : i32
    %c0_i32_0 = arith.constant 0 : i32
    %c0_i32_1 = arith.constant 0 : i32
    return %c0_i32, %c0_i32_0 : i32, i32
  }
  func.func @transform_2(%arg0: i32) -> (i32, i32) {
    %c0_i32 = arith.constant 0 : i32
    %c0_i32_0 = arith.constant 0 : i32
    %c0_i32_1 = arith.constant 0 : i32
    return %c0_i32, %c0_i32_0 : i32, i32
  }
  func.func @transform_3(%arg0: i32) -> (i32, i32) {
    %c0_i32 = arith.constant 0 : i32
    %c0_i32_0 = arith.constant 0 : i32
    return %arg0, %c0_i32 : i32, i32
  }
}

</mosaic_0001>

<bundles_post_ra>
// kernel: tpu_custom_call.1
= control target key start
LH: loop header
LB: loop body
LE: loop exit
PB: predicated region body
PF: predicated region fallthrough
CT: control target
= control target key end

     0   :  { %8 = vsyncpa [#allocation3], 0  ;;  %s1544_s0 = inlined_call_operand.hbm [shape: f32[20,768], index: 0, kind: input, shape index: {}]   ;;  %s1545_s1 = inlined_call_operand.hbm [shape: bf16[768,128], index: 1, kind: input, shape index: {}]   ;;  %s1546_s2 = inlined_call_operand.vmem [shape: f32[1,128], index: 2, kind: input, shape index: {}]   ;;  %s1547_s3 = inlined_call_operand.hbm [shape: f32[20,128], index: 3, kind: output, shape index: {}]  }
   0x1   :  { %10 = vsyncpa [#allocation3 + $0x1], 0 }
   0x2   :  { %11 = vsyncpa [#allocation6], 0 }
   0x3   :  { %12 = vsyncpa [#allocation4], 0 }
   0x4   :  { %14 = vsyncpa [#allocation4 + $0x1], 0  ;;  %s1331_s12 = smov 0   ;;  %s1333_s13 = smov 0  }
   0x5   :  { %s1335_s14 = smov 0   ;;  %s1337_s15 = smov 0  }
   0x6 LB: > { %s1352_s16 = sadd.s32 4294967295, %s1300_s15   ;;  %s826_s17 = sadd.s32 4294967294, %s1300_s15   ;;  %s1300_s15 = sphi %s1337_s15, %s1564_s15   ;;  %s1296_s14 = sphi %s1335_s14, %s1563_s14   ;;  %s1292_s13 = sphi %s1333_s13, %s1562_s13   ;;  %s1288_s12 = sphi %s1331_s12, %s1561_s12  }
   0x7   : > { %s1356_s18 = sadd.s32 1, %s1300_s15   ;;  %s27_s19 = sadd.s32 1, %s1296_s14 }
   0x8   : > { %s24_s20 = ssub.s32 %s1300_s15, %s1356_s18  ;;  %p34_p0 = scmp.ne.s32.totalorder %s1296_s14, %s1292_s13 }
   0x9   : > { %p25_p1 = scmp.eq.s32.totalorder %s24_s20, 0  ;;  %p35_p2 = scmp.eq.s32.totalorder %s1300_s15, 0 }
   0xa   : > { %p40_p3 = scmp.ne.s32.totalorder %s1292_s13, %s1288_s12  ;;  %p1549_p4 = scmp.eq.s32.totalorder %s1352_s16, 0 }
   0xb   : > { %s1368_s21 = scalar_select %p25_p1, %s1296_s14, %s27_s19  }
   0xc   : > { %p1370_p5 = por %p35_p2, %p34_p0  ;;  %p1376_p6 = por %p1549_p4, %p40_p3 }
   0xd   : > { %p106_p7 = scmp.eq.s32.totalorder %s1352_s16, 1  ;;  %p112_p8 = scmp.eq.s32.totalorder %s826_s17, 1 }
   0xe   : > { %p827_p9 = scmp.ge.s32.totalorder %s1300_s15, 1  ;;  %p119_p10 = scmp.lt.s32.totalorder %s1300_s15, 3 }
   0xf   : > { %p1383_p11 = por %p106_p7, %p34_p0  ;;  %p1387_p12 = por %p112_p8, %p40_p3 }
  0x10   : > { %p1391_p13 = pnand %p827_p9, %p119_p10  ;;  %s130_s29 = sshll.u32 %s1545_s1, 4  ;;  %s131_s29 = int_to_ptr.hbm [resolvable:$true] %s130_s29 }
  0x11   : > { %s1553_s25 = scalar_select %p1387_p12, 1, 0 }
  0x12   : > { %p1099_p1 = pneg %p1391_p13  ;;  %s1302_s30 = smov [#allocation5]  }
  0x13   : > { %s132_s4 = sshll.u32 %s1302_s30, 4  ;;  %s1303_s5 = smov 64   ;;  %s133_s4 = int_to_ptr.vmem [resolvable:$true] %s132_s4 }
  0x14   : > { %p1100_p0 = pnand %p1099_p1, %p1549_p4  ;;  %s1304_s6 = smov 4  }
  0x15   : > { %p1548_p2 = scmp.ge.s32.totalorder %s1300_s15, 2 }
  0x16   : > { %1102 = dma.hbm_to_vmem [thread:$0]  (!%p1100_p0), %s131_s29, 6144, %s133_s4, [#allocation6], %s1303_s5, %s1303_s5, %s1304_s6  }
  0x17   : > { %145 = sbr.rel (%p1548_p2) target bundleno = 69 (0x45), region = 24 }
  0x1c   : > { %148 = sbr.rel (!%p1370_p5) target bundleno = 69 (0x45), region = 28  ;;  %s149_s7 = sand.u32 (%p1370_p5), 1, %s1296_s14  }
  0x1d   : > { %s830_s8 = sshll.u32 (%p1370_p5), %s1300_s15, 1  ;;  %s1090_s9 = smul.u32 (%p1370_p5), 96, %s149_s7 }
  0x1e   : > { %s155_s10 = ssub.s32 (%p1370_p5), 3, %s830_s8  ;;  %s1409_s20 = scalar_lea.sflag (%p1370_p5), [#allocation3], %s149_s7 }
  0x1f   : > { %p156_p3 = scmp.lt.s32.totalorder (%p1370_p5), %s155_s10, 2  ;;  %s153_s27 = scalar_lea.vmem (%p1370_p5), [#allocation2], %s1090_s9 }
  0x21   : > { %s1566_s10 = smov (!%p156_p3, %s155_s10), 2 }
  0x22   : > { %s832_s11 = smul.u32 48, %s1566_s10 }
  0x24   : > { %s160_s17 = ssub.s32 96, %s832_s11 }
  0x25   : > { %s161_s19 = sshll.u32 %s160_s17, 4 }
  0x26   : > { %162 = vsyncadd %s1409_s20, %s161_s19  ;;  %p1412_p7 = scmp.ne.s32.totalorder %s832_s11, 0  ;;  %s1091_s28 = smul.u32 96, %s1300_s15 }
  0x27   : > { %s1417_s29 = sshll.u32 %s153_s27, 4  ;;  %s1419_s30 = smul.u32 768, %s1566_s10  ;;  %s171_s29 = int_to_ptr.vmem [resolvable:$true] %s1417_s29 }
  0x28   : > { %s166_s6 = scalar_lea.hbm %s1544_s0, %s1091_s28  ;;  %s1191_s28 = scalar_lea.hbm %s1544_s0, 144 }
  0x29   : > { %s168_s7 = sshll.u32 %s166_s6, 4  ;;  %s1182_s9 = sshrl.u32 %s1419_s30, 4  ;;  %s1425_s7 = int_to_ptr.hbm [resolvable:$true] %s168_s7 }
  0x2a   : > { %s1180_s8 = sshra.s32 %s1425_s7, 4  ;;  %s1218_s11 = sshll.u32 %s1182_s9, 4  ;;  %s1181_s8 = int_to_ptr.hbm [resolvable:$true] %s1180_s8 }
  0x2b   : > { %p1184_p5 = scmp.ne.s32.totalorder %s1218_s11, %s1419_s30  ;;  %s1185_s17 = sadd.s32 1, %s1182_s9 }
  0x2c   : > { %p1192_p1 = scmp.lt.s32.totalorder %s1181_s8, %s1544_s0 }
  0x2d   : > { %s1568_s17 = smov (!%p1184_p5, %s1185_s17), %s1182_s9 }
  0x2e   : > { %s1187_s10 = scalar_lea.hbm %s1181_s8, %s1568_s17 }
  0x2f   : > { %p1188_p8 = scmp.ne.s32.totalorder %s1181_s8, %s1187_s10  ;;  %p1193_p0 = scmp.lt.s32.totalorder %s1191_s28, %s1187_s10 }
  0x31   : > { %p1189_p9 = pnand %p1188_p8, %p1412_p7  ;;  %p1194_p3 = por %p1193_p0, %p1192_p1 }
  0x33   : > { %p1190_p10 = pneg %p1189_p9 }
  0x35   : > { %p1195_p2 = pnand %p1194_p3, %p1190_p10 }
  0x37   : > { %1198 = shalt.err (!%p1195_p2)
}
  0x38   : > { %s1199_s6 = sshra.s32 %s171_s29, 4  ;;  %s1305_s11 = smov [#allocation2]   ;;  %s1200_s6 = int_to_ptr.vmem [resolvable:$true] %s1199_s6 }
  0x39   : > { %s1206_s9 = scalar_lea.vmem %s1200_s6, %s1568_s17  ;;  %s1210_s19 = scalar_lea.vmem %s1305_s11, 192 }
  0x3a   : > { %p1207_p5 = scmp.ne.s32.totalorder %s1200_s6, %s1206_s9  ;;  %p1212_p4 = scmp.lt.s32.totalorder %s1210_s19, %s1206_s9 }
  0x3c   : > { %p1208_p8 = pnand %p1207_p5, %p1412_p7 }
  0x3e   : > { %p1209_p9 = pneg %p1208_p8 }
  0x40   : > { %p1214_p12 = pnand %p1212_p4, %p1209_p9 }
  0x42   : > { %1217 = shalt.err (!%p1214_p12)
}
  0x43   : > { %s1306_s8 = smov 768   ;;  %s1307_s10 = smov 48  }
  0x44   : > { %176 = dma.hbm_to_vmem [thread:$0]  (%p1412_p7), %s1425_s7, %s1419_s30, %s171_s29, %s1409_s20, %s1306_s8, %s1306_s8, %s1307_s10  }
  0x45 PF: > { %182 = sbr.rel (%p1391_p13) target bundleno = 312 (0x138), region = 32  ;;  %s1452_s17 = sand.u32 (!%p1391_p13), 1, %s1292_s13  }
  0x46   : > { %s1092_s27 = smul.u32 (!%p1391_p13), 96, %s1452_s17  ;;  %s185_s28 = scalar_lea.sflag (!%p1391_p13), [#allocation3], %s1452_s17 }
  0x48   : > { %s1456_s4 = scalar_lea.vmem (!%p1391_p13), [#allocation2], %s1092_s27 }
  0x4a   : > { %1275 = dma.done.wait (%p1376_p6), %s185_s28, 1536  }
  0x4b   : > { %1277 = vsyncadd (%p1376_p6), %s185_s28, 4294965760  ;;  %p1556_p4 = scmp.eq.s32.totalorder %s1352_s16, 0 }
  0x4d   : > { %1279 = dma.done.wait (%p1556_p4), [#allocation6], 6144   ;;  %p1557_p12 = pmov %p1556_p4 }
  0x4e   : > { %v1048_v0 = vld [vmem:[#allocation5 + $0x38] sm:$0xff]  ;;  %v1047_v4 = vld [vmem:[#allocation5 + $0x30] sm:$0xff]  ;;  %v1046_v8 = vld [vmem:[#allocation5 + $0x28] sm:$0xff]  ;;  %s839_s20 = sshll.u32 %s1452_s17, 4  ;;  %s721_s29 = scalar_lea.sflag [#allocation4], %s1452_s17 }
  0x4f   : > { %1281 = vsyncadd (%p1557_p12), [#allocation6], 4294961152  ;;  %v1056_v1 = vld [vmem:[#allocation5 + $0x78] sm:$0xff]  ;;  %634 = vmatpush.bf16.msra.mxu0 %v1048_v0  ;;  %v1055_v5 = vld [vmem:[#allocation5 + $0x70] sm:$0xff]  ;;  %s216_s22 = scalar_lea.vmem [#allocation7], %s839_s20  ;;  %s1033_s30 = sshll.u32 (%p1383_p11), %s1352_s16, 1 }
  0x50   : > { %v1064_v2 = vld [vmem:[#allocation5 + $0xb8] sm:$0xff]  ;;  %648 = vmatpush.bf16.msra.mxu1 %v1056_v1  ;;  %v1063_v6 = vld [vmem:[#allocation5 + $0xb0] sm:$0xff]  ;;  %v1054_v9 = vld [vmem:[#allocation5 + $0x68] sm:$0xff]  ;;  %s729_s7 = ssub.s32 (%p1383_p11), 3, %s1033_s30 }
  0x51   : > { %v1072_v3 = vld [vmem:[#allocation5 + $0xf8] sm:$0xff]  ;;  %662 = vmatpush.bf16.msra.mxu2 %v1064_v2  ;;  %v1071_v7 = vld [vmem:[#allocation5 + $0xf0] sm:$0xff]  ;;  %v1062_v10 = vld [vmem:[#allocation5 + $0xa8] sm:$0xff]  ;;  %p730_p6 = scmp.lt.s32.totalorder (%p1383_p11), %s729_s7, 2 }
  0x52   : > { %676 = vmatpush.bf16.msra.mxu3 %v1072_v3  ;;  %v1070_v11 = vld [vmem:[#allocation5 + $0xe8] sm:$0xff]  ;;  %v1045_v12 = vld [vmem:[#allocation5 + $0x20] sm:$0xff]  ;;  %v1044_v16 = vld [vmem:[#allocation5 + $0x18] sm:$0xff] }
  0x53   : > { %635 = vmatpush.bf16.msra.mxu0 %v1047_v4  ;;  %v1053_v13 = vld [vmem:[#allocation5 + $0x60] sm:$0xff]  ;;  %v1052_v17 = vld [vmem:[#allocation5 + $0x58] sm:$0xff]  ;;  %v1043_v20 = vld [vmem:[#allocation5 + $0x10] sm:$0xff] }
  0x54   : > { %649 = vmatpush.bf16.msra.mxu1 %v1055_v5  ;;  %v1061_v14 = vld [vmem:[#allocation5 + $0xa0] sm:$0xff]  ;;  %v1060_v18 = vld [vmem:[#allocation5 + $0x98] sm:$0xff]  ;;  %v1051_v21 = vld [vmem:[#allocation5 + $0x50] sm:$0xff] }
  0x55   : > { %663 = vmatpush.bf16.msra.mxu2 %v1063_v6  ;;  %v1069_v15 = vld [vmem:[#allocation5 + $0xe0] sm:$0xff]  ;;  %v1068_v19 = vld [vmem:[#allocation5 + $0xd8] sm:$0xff]  ;;  %v1059_v22 = vld [vmem:[#allocation5 + $0x90] sm:$0xff] }
  0x56   : > { %677 = vmatpush.bf16.msra.mxu3 %v1071_v7  ;;  %v1067_v23 = vld [vmem:[#allocation5 + $0xd0] sm:$0xff]  ;;  %v1042_v24 = vld [vmem:[#allocation5 + $0x8] sm:$0xff]  ;;  %v1041_v28 = vld [vmem:[#allocation5] sm:$0xff] }
  0x57   : > { %636 = vmatpush.bf16.msra.mxu0 %v1046_v8  ;;  %v1050_v25 = vld [vmem:[#allocation5 + $0x48] sm:$0xff]  ;;  %v1049_v29 = vld [vmem:[#allocation5 + $0x40] sm:$0xff]  ;;  %v234_v31 = vld [vmem:[%s1456_s4 + $0x30] sm:$0xff] }
  0x58   : > { %650 = vmatpush.bf16.msra.mxu1 %v1054_v9  ;;  %v1058_v26 = vld [vmem:[#allocation5 + $0x88] sm:$0xff]  ;;  %v228_v30 = vld [vmem:[%s1456_s4] sm:$0xff]  ;;  %v235_v33 = vld [vmem:[%s1456_s4 + $0x38] sm:$0xff] }
  0x59   : > { %664 = vmatpush.bf16.msra.mxu2 %v1062_v10  ;;  %v1066_v27 = vld [vmem:[#allocation5 + $0xc8] sm:$0xff]  ;;  %v1080_v34 = vld [vmem:[#allocation5 + $0x138] sm:$0xff]  ;;  %v1057_v36 = vld [vmem:[#allocation5 + $0x80] sm:$0xff]  ;;  %v240_v40 = vpack.c.bf16 %v234_v31, %v228_v30 }
  0x5a   : > { %678 = vmatpush.bf16.msra.mxu3 %v1070_v11  ;;  %v229_v32 = vld [vmem:[%s1456_s4 + $0x8] sm:$0xff]  ;;  %v1088_v35 = vld [vmem:[#allocation5 + $0x178] sm:$0xff]  ;;  %v1065_v37 = vld [vmem:[#allocation5 + $0xc0] sm:$0xff] }
  0x5b   : > { %637 = vmatpush.bf16.msra.mxu0 %v1045_v12  ;;  %v230_v38 = vld [vmem:[%s1456_s4 + $0x10] sm:$0xff]  ;;  %v236_v39 = vld [vmem:[%s1456_s4 + $0x40] sm:$0xff]  ;;  %v231_v41 = vld [vmem:[%s1456_s4 + $0x18] sm:$0xff]  ;;  %v241_v43 = vpack.c.bf16 %v235_v33, %v229_v32 }
  0x5c   : > { %651 = vmatpush.bf16.msra.mxu1 %v1053_v13  ;;  %v237_v42 = vld [vmem:[%s1456_s4 + $0x48] sm:$0xff]  ;;  %v1079_v44 = vld [vmem:[#allocation5 + $0x130] sm:$0xff]  ;;  %v242_v46 = vpack.c.bf16 %v236_v39, %v230_v38  ;;  %v1077_v50 = vld [vmem:[#allocation5 + $0x120] sm:$0xff] }
  0x5d   : > { %665 = vmatpush.bf16.msra.mxu2 %v1061_v14  ;;  %v1087_v45 = vld [vmem:[#allocation5 + $0x170] sm:$0xff]  ;;  %v243_v47 = vpack.c.bf16 %v237_v42, %v231_v41  ;;  %v1078_v48 = vld [vmem:[#allocation5 + $0x128] sm:$0xff]  ;;  %v1085_v51 = vld [vmem:[#allocation5 + $0x160] sm:$0xff] }
  0x5e   : > { %679 = vmatpush.bf16.msra.mxu3 %v1069_v15  ;;  %v1086_v49 = vld [vmem:[#allocation5 + $0x168] sm:$0xff]  ;;  %v1076_v52 = vld [vmem:[#allocation5 + $0x118] sm:$0xff]  ;;  %v1075_v54 = vld [vmem:[#allocation5 + $0x110] sm:$0xff] }
  0x5f   : > { %638 = vmatpush.bf16.msra.mxu0 %v1044_v16  ;;  %v1084_v53 = vld [vmem:[#allocation5 + $0x158] sm:$0xff]  ;;  %v1083_v55 = vld [vmem:[#allocation5 + $0x150] sm:$0xff]  ;;  %v1074_v56 = vld [vmem:[#allocation5 + $0x108] sm:$0xff] }
  0x60   : > { %652 = vmatpush.bf16.msra.mxu1 %v1052_v17  ;;  %v1082_v57 = vld [vmem:[#allocation5 + $0x148] sm:$0xff]  ;;  %v1073_v58 = vld [vmem:[#allocation5 + $0x100] sm:$0xff]  ;;  %v238_v61 = vld [vmem:[%s1456_s4 + $0x50] sm:$0xff] }
  0x61   : > { %666 = vmatpush.bf16.msra.mxu2 %v1060_v18  ;;  %v1081_v59 = vld [vmem:[#allocation5 + $0x140] sm:$0xff]  ;;  %v233_v62 = vld [vmem:[%s1456_s4 + $0x28] sm:$0xff]  ;;  %v239_v63 = vld [vmem:[%s1456_s4 + $0x58] sm:$0xff] }
  0x62   : > { %680 = vmatpush.bf16.msra.mxu3 %v1068_v19  ;;  %v232_v60 = vld [vmem:[%s1456_s4 + $0x20] sm:$0xff]  ;;  %v245_v1 = vpack.c.bf16 %v239_v63, %v233_v62 }
  0x63   : > { %639 = vmatpush.bf16.msra.mxu0 %v1043_v20  ;;  %v244_v0 = vpack.c.bf16 %v238_v61, %v232_v60  ;;  %v1149_v4 = vld [vmem:[%s1546_s2] ss:$0 sm:$0xff] }
  0x64   : > { %653 = vmatpush.bf16.msra.mxu1 %v1051_v21 }
  0x65   : > { %667 = vmatpush.bf16.msra.mxu2 %v1059_v22 }
  0x66   : > { %681 = vmatpush.bf16.msra.mxu3 %v1067_v23 }
  0x67   : > { %640 = vmatpush.bf16.msra.mxu0 %v1042_v24 }
  0x68   : > { %654 = vmatpush.bf16.msra.mxu1 %v1050_v25 }
  0x69   : > { %668 = vmatpush.bf16.msra.mxu2 %v1058_v26 }
  0x6a   : > { %682 = vmatpush.bf16.msra.mxu3 %v1066_v27 }
  0x6b   : > { %641 = vmatpush.bf16.msra.mxu0 %v1041_v28 }
  0x6c   : > { %655 = vmatpush.bf16.msra.mxu1 %v1049_v29 }
  0x6d   : > { %669 = vmatpush.bf16.msra.mxu2 %v1057_v36 }
  0x6e   : > { %683 = vmatpush.bf16.msra.mxu3 %v1065_v37  ;;  %642 = vmatmul.bf16.vlgmr.msra.gmra.mxu0 %v240_v40 }
  0x6f   : > { %690 = vmatpush.bf16.msrb.mxu0 %v1080_v34  ;;  %656 = vmatmul.bf16.vlgmr.msra.gmra.mxu1 %v241_v43 }
  0x70   : > { %704 = vmatpush.bf16.msrb.mxu1 %v1088_v35  ;;  %670 = vmatmul.bf16.vlgmr.msra.gmra.mxu2 %v242_v46 }
  0x71   : > { %684 = vmatmul.bf16.vlgmr.msra.gmra.mxu3 %v243_v47 }
  0x73   : > { %691 = vmatpush.bf16.msrb.mxu0 %v1079_v44 }
  0x74   : > { %705 = vmatpush.bf16.msrb.mxu1 %v1087_v45 }
  0x77   : > { %692 = vmatpush.bf16.msrb.mxu0 %v1078_v48 }
  0x78   : > { %706 = vmatpush.bf16.msrb.mxu1 %v1086_v49 }
  0x7b   : > { %693 = vmatpush.bf16.msrb.mxu0 %v1077_v50 }
  0x7c   : > { %707 = vmatpush.bf16.msrb.mxu1 %v1085_v51 }
  0x7f   : > { %694 = vmatpush.bf16.msrb.mxu0 %v1076_v52 }
  0x80   : > { %708 = vmatpush.bf16.msrb.mxu1 %v1084_v53 }
  0x83   : > { %695 = vmatpush.bf16.msrb.mxu0 %v1075_v54 }
  0x84   : > { %709 = vmatpush.bf16.msrb.mxu1 %v1083_v55 }
  0x87   : > { %696 = vmatpush.bf16.msrb.mxu0 %v1074_v56 }
  0x88   : > { %710 = vmatpush.bf16.msrb.mxu1 %v1082_v57 }
  0x8b   : > { %697 = vmatpush.bf16.msrb.mxu0 %v1073_v58 }
  0x8c   : > { %711 = vmatpush.bf16.msrb.mxu1 %v1081_v59 }
  0x8e   : > { %698 = vmatmul.bf16.vlgmr.msrb.gmra.mxu0 %v244_v0 }
  0x8f   : > { %712 = vmatmul.bf16.vlgmr.msrb.gmra.mxu1 %v245_v1 }
  0xeb   : > { %v643_v2 = vpop.f32.mrf.mxu0 }
  0xec   : > { %v657_v3 = vpop.f32.mrf.mxu1  ;;  %v644_v5 = vadd.f32 %v1149_v4, %v643_v2 }
  0xee   : > { %v658_v7 = vadd.f32 %v657_v3, %v644_v5 }
  0xf3   : > { %v671_v6 = vpop.f32.mrf.mxu2  ;;  %v645_v8 = vpop.f32.mrf.mxu0 }
  0xf4   : > { %v659_v9 = vpop.f32.mrf.mxu1  ;;  %v685_v10 = vpop.f32.mrf.mxu3  ;;  %v672_v11 = vadd.f32 %v671_v6, %v658_v7  ;;  %v646_v12 = vadd.f32 %v1149_v4, %v645_v8 }
  0xf6   : > { %v686_v13 = vadd.f32 %v685_v10, %v672_v11  ;;  %v660_v14 = vadd.f32 %v659_v9, %v646_v12 }
  0xfb   : > { %v673_v15 = vpop.f32.mrf.mxu2 }
  0xfc   : > { %v674_v19 = vadd.f32 %v673_v15, %v660_v14  ;;  %v687_v21 = vpop.f32.mrf.mxu3 }
  0xfe   : > { %v688_v22 = vadd.f32 %v687_v21, %v674_v19 }
 0x10b   : > { %v699_v16 = vpop.f32.mrf.mxu0 }
 0x10c   : > { %v713_v17 = vpop.f32.mrf.mxu1  ;;  %v700_v18 = vadd.f32 %v699_v16, %v686_v13 }
 0x10e   : > { %v714_v20 = vadd.f32 %v713_v17, %v700_v18 }
 0x110   : > { %718 = vst [vmem:[%s216_s22] sm:$0xff] %v714_v20 }
 0x113   : > { %v701_v23 = vpop.f32.mrf.mxu0 }
 0x114   : > { %v702_v24 = vadd.f32 %v701_v23, %v688_v22  ;;  %v715_v25 = vpop.f32.mrf.mxu1  ;;  %727 = sbr.rel (!%p1383_p11) target bundleno = 312 (0x138), region = 44 }
 0x116   : > { %v716_v26 = vadd.f32 %v715_v25, %v702_v24 }
 0x118   : > { %719 = vst [vmem:[%s216_s22 + $0x8] sm:$0xff] %v716_v26 }
 0x119   : > { %s1570_s7 = smov (!%p730_p6, %s729_s7), 2 }
 0x11a   : > { %s1034_s5 = sshll.u32 %s1570_s7, 3 }
 0x11b   : > { %s733_s6 = ssub.s32 16, %s1034_s5 }
 0x11c   : > { %s734_s9 = sshll.u32 %s733_s6, 4 }
 0x11d   : > { %735 = vsyncadd %s721_s29, %s734_s9  ;;  %p1491_p13 = scmp.ne.s32.totalorder %s1034_s5, 0  ;;  %s1089_s24 = sshll.u32 %s1352_s16, 4 }
 0x11e   : > { %s738_s10 = scalar_lea.hbm %s1547_s3, %s1089_s24  ;;  %s740_s27 = sshll.u32 %s216_s22, 4  ;;  %s1499_s27 = int_to_ptr.vmem [resolvable:$true] %s740_s27 }
 0x11f   : > { %s742_s28 = sshll.u32 %s738_s10, 4  ;;  %s1038_s4 = sshll.u32 %s1570_s7, 7  ;;  %s1501_s28 = int_to_ptr.hbm [resolvable:$true] %s742_s28 }
 0x120   : > { %s1219_s23 = sshra.s32 %s1499_s27, 4  ;;  %s1221_s26 = sshrl.u32 %s1038_s4, 4  ;;  %s1220_s23 = int_to_ptr.vmem [resolvable:$true] %s1219_s23 }
 0x121   : > { %s1226_s20 = scalar_lea.vmem %s1220_s23, %s1221_s26  ;;  %s1308_s16 = smov [#allocation7]  }
 0x122   : > { %p1227_p11 = scmp.ne.s32.totalorder %s1220_s23, %s1226_s20  ;;  %s1230_s30 = scalar_lea.vmem %s1308_s16, 32 }
 0x123   : > { %p1232_p10 = scmp.lt.s32.totalorder %s1230_s30, %s1226_s20 }
 0x124   : > { %p1228_p2 = pnand %p1227_p11, %p1491_p13 }
 0x126   : > { %p1229_p7 = pneg %p1228_p2 }
 0x128   : > { %p1234_p1 = pnand %p1232_p10, %p1229_p7 }
 0x12a   : > { %1237 = shalt.err (!%p1234_p1)
}
 0x12b   : > { %s1238_s22 = sshra.s32 %s1501_s28, 4  ;;  %s1249_s24 = scalar_lea.hbm %s1547_s3, 24  ;;  %s1239_s22 = int_to_ptr.hbm [resolvable:$true] %s1238_s22 }
 0x12c   : > { %s1245_s5 = scalar_lea.hbm %s1239_s22, %s1221_s26  ;;  %p1250_p8 = scmp.lt.s32.totalorder %s1239_s22, %s1547_s3 }
 0x12d   : > { %p1246_p0 = scmp.ne.s32.totalorder %s1239_s22, %s1245_s5  ;;  %p1251_p9 = scmp.lt.s32.totalorder %s1249_s24, %s1245_s5 }
 0x12f   : > { %p1247_p3 = pnand %p1246_p0, %p1491_p13  ;;  %p1252_p4 = por %p1251_p9, %p1250_p8 }
 0x131   : > { %p1248_p5 = pneg %p1247_p3 }
 0x133   : > { %p1253_p12 = pnand %p1252_p4, %p1248_p5 }
 0x135   : > { %1256 = shalt.err (!%p1253_p12)
}
 0x136   : > { %s1309_s10 = smov 128   ;;  %s1310_s23 = smov 8  }
 0x137   : > { %748 = dma.vmem_to_hbm [thread:$0]  (%p1491_p13), %s1499_s27, %s1038_s4, %s1501_s28, %s721_s29, %s1309_s10, %s1309_s10, %s1310_s23  }
 0x138 PF: > { %s757_s26 = sand.u32 1, %s1288_s12   ;;  %p1559_p6 = scmp.ne.s32.totalorder %s1553_s25, 0 }
 0x139   : > { %p1560_p11 = scmp.ge.s32.totalorder %s1300_s15, 2  ;;  %s758_s20 = scalar_lea.sflag [#allocation4], %s757_s26 }
 0x13b   : > { %p1104_p2 = pnand %p1560_p11, %p1559_p6 }
 0x13d   : > { %p1105_p7 = pneg %p1104_p2 }
 0x13f   : > { %1283 = dma.done.wait (%p1105_p7), %s758_s20, 256  }
 0x140   : > { %1285 = vsyncadd (%p1105_p7), %s758_s20, 4294967040  ;;  %p17_p10 = scmp.ge.s32.totalorder %s1356_s18, 4   ;;  %s1561_s12 = smov %s1292_s13 }
 0x141   : > { %s1562_s13 = smov %s1296_s14  ;;  %s1563_s14 = smov %s1368_s21 }
 0x142   : > { %s1564_s15 = smov %s1356_s18  ;;  %19 = sbr.rel (!%p17_p10) target bundleno = 6 (0x6), region = 81 }
 0x147   :  { %764 = vsyncpa [#allocation3], 1 }
 0x148   :  { %766 = vsyncpa [#allocation3 + $0x1], 1 }
 0x149   :  { %767 = vsyncpa [#allocation6], 1 }
 0x14a   :  { %768 = vsyncpa [#allocation4], 1 }
 0x14b   :  { %770 = vsyncpa [#allocation4 + $0x1], 1 }

</bundles_post_ra>
